<compile_context>
chip_gen: v7x
topology: tpu7x:2x2x1
jax: 0.10.0
libtpu: 0.0.40
codegen_flags: <defaults>
</compile_context>

<pallas_src>
import math

import jax
import jax.numpy as jnp
from jax import lax
from jax.experimental import pallas as pl
from jax.experimental.pallas import tpu as pltpu


DTYPE = jnp.bfloat16            # weights / activations (MXU-native)
VMEM_LIMIT = 48 * 1024 * 1024   # fits v7x (64 MiB/TC) with headroom; fine on v5e/v6e
MASK_VALUE = -1e30              # finite large-negative mask (no NaN for fully-masked rows)
LN_EPS = 1e-5


# ---------------------------------------------------------------------------
# helpers
# ---------------------------------------------------------------------------
def _pick_tile(dim, target, quantum):
    """Largest tile <= target that divides dim and is a multiple of quantum.
    Falls back to the full dimension (always BlockSpec-legal)."""
    if dim <= target:
        return dim
    t = (target // quantum) * quantum
    while t >= quantum:
        if dim % t == 0:
            return t
        t -= quantum
    return dim


_SQRT1_2 = 0.7071067811865476


def _erf_approx(x):
    # Abramowitz & Stegun 7.1.26 (|err| < 1.5e-7); only mul/add/exp -> VPU/EUP.
    a1, a2, a3, a4, a5 = 0.254829592, -0.284496736, 1.421413741, -1.453152027, 1.061405429
    p = 0.3275911
    ax = jnp.abs(x)
    t = 1.0 / (1.0 + p * ax)
    poly = ((((a5 * t + a4) * t + a3) * t + a2) * t + a1) * t
    y = 1.0 - poly * jnp.exp(-ax * ax)
    return jnp.where(x >= 0.0, y, -y)


def _gelu_exact(x):
    # nn.GELU() default (exact erf form), to ~1.5e-7 absolute.
    return 0.5 * x * (1.0 + _erf_approx(x * _SQRT1_2))


def _layernorm_f32(x, gain):
    mu = jnp.mean(x, axis=-1, keepdims=True)
    xc = x - mu
    var = jnp.mean(xc * xc, axis=-1, keepdims=True)
    return xc * lax.rsqrt(var + LN_EPS) * gain


# ---------------------------------------------------------------------------
# Kernel 1: fused LayerNorm + linear  (full-K per grid step), optional GELU.
#   x:(M,K) bf16, gain:(1,K) f32, w:(K,N) bf16  ->  (M,N) bf16
# ---------------------------------------------------------------------------
def _make_ln_linear_kernel(activation):
    def kernel(x_ref, g_ref, w_ref, o_ref):
        x = x_ref[...].astype(jnp.float32)
        h = _layernorm_f32(x, g_ref[...].astype(jnp.float32))
        out = jnp.dot(h.astype(w_ref.dtype), w_ref[...],
                      preferred_element_type=jnp.float32)
        if activation is not None:
            out = activation(out)
        o_ref[...] = out.astype(o_ref.dtype)
    return kernel


def ln_linear(x2d, gain, w, *, activation=None, tm_target=512, tn_target=1024):
    M, K = x2d.shape
    K2, N = w.shape
    assert K == K2
    tm = _pick_tile(M, tm_target, 16)      # bf16 sublane quantum
    tn = _pick_tile(N, tn_target, 128)
    act_fn = _gelu_exact if activation == "gelu" else None
    return pl.pallas_call(
        _make_ln_linear_kernel(act_fn),
        out_shape=jax.ShapeDtypeStruct((M, N), x2d.dtype),
        grid=(M // tm, N // tn),
        in_specs=[pl.BlockSpec((tm, K), lambda i, j: (i, 0)),
                  pl.BlockSpec((1, K), lambda i, j: (0, 0)),
                  pl.BlockSpec((K, tn), lambda i, j: (0, j))],
        out_specs=pl.BlockSpec((tm, tn), lambda i, j: (i, j)),
        compiler_params=pltpu.CompilerParams(
            dimension_semantics=("parallel", "parallel"),
            vmem_limit_bytes=VMEM_LIMIT),
    )(x2d, gain, w)


# ---------------------------------------------------------------------------
# Kernel 2: tiled linear (M,K)@(K,N)->(M,N) with K grid axis, f32 accumulator,
#           fused residual-add epilogue (used for the two c_proj layers).
# ---------------------------------------------------------------------------
def _make_linear_kernel(add_residual):
    if add_residual:
        def kernel(x_ref, w_ref, r_ref, o_ref, acc_ref):
            @pl.when(pl.program_id(2) == 0)
            def _():
                acc_ref[...] = jnp.zeros_like(acc_ref)

            acc_ref[...] += jnp.dot(x_ref[...], w_ref[...],
                                    preferred_element_type=jnp.float32)

            @pl.when(pl.program_id(2) == pl.num_programs(2) - 1)
            def _():
                out = acc_ref[...] + r_ref[...].astype(jnp.float32)
                o_ref[...] = out.astype(o_ref.dtype)
        return kernel

    def kernel(x_ref, w_ref, o_ref, acc_ref):
        @pl.when(pl.program_id(2) == 0)
        def _():
            acc_ref[...] = jnp.zeros_like(acc_ref)

        acc_ref[...] += jnp.dot(x_ref[...], w_ref[...],
                                preferred_element_type=jnp.float32)

        @pl.when(pl.program_id(2) == pl.num_programs(2) - 1)
        def _():
            o_ref[...] = acc_ref[...].astype(o_ref.dtype)
    return kernel


def linear(x2d, w, *, residual=None,
           tm_target=512, tn_target=1024, tk_target=1024):
    M, K = x2d.shape
    K2, N = w.shape
    assert K == K2
    tm = _pick_tile(M, tm_target, 16)
    tn = _pick_tile(N, tn_target, 128)
    tk = _pick_tile(K, tk_target, 128)
    grid = (M // tm, N // tn, K // tk)

    in_specs = [pl.BlockSpec((tm, tk), lambda i, j, k: (i, k)),
                pl.BlockSpec((tk, tn), lambda i, j, k: (k, j))]
    args = [x2d, w]
    if residual is not None:
        # residual block is invariant across k -> not re-DMAed per K step
        in_specs.append(pl.BlockSpec((tm, tn), lambda i, j, k: (i, j)))
        args.append(residual)

    return pl.pallas_call(
        _make_linear_kernel(residual is not None),
        out_shape=jax.ShapeDtypeStruct((M, N), x2d.dtype),
        grid=grid,
        in_specs=in_specs,
        out_specs=pl.BlockSpec((tm, tn), lambda i, j, k: (i, j)),
        scratch_shapes=[pltpu.VMEM((tm, tn), jnp.float32)],
        compiler_params=pltpu.CompilerParams(
            dimension_semantics=("parallel", "parallel", "arbitrary"),
            vmem_limit_bytes=VMEM_LIMIT),
    )(*args)


# ---------------------------------------------------------------------------
# Kernel 3: causal multi-head attention.
#   Grid = (batch, head_group); each group is a lane-aligned 128-wide (or
#   head_dim-wide if head_dim >= 128) column slab of the (B, T, 3C) qkv
#   activation, so all loads and the output store are unmasked full-lane ops.
# ---------------------------------------------------------------------------
def _make_attn_kernel(heads_per_step, hd):
    scale = 1.0 / math.sqrt(hd)

    def kernel(q_ref, k_ref, v_ref, o_ref):
        T = q_ref.shape[1]
        row = lax.broadcasted_iota(jnp.int32, (T, T), 0)
        col = lax.broadcasted_iota(jnp.int32, (T, T), 1)
        causal = col <= row

        parts = []
        for hh in range(heads_per_step):           # <=2 heads per step for GPT-2 sizes
            sl = slice(hh * hd, (hh + 1) * hd)
            q = q_ref[0, :, sl]                    # (T, hd) bf16
            k = k_ref[0, :, sl]
            v = v_ref[0, :, sl]

            # QK^T contracting last dims (no k.T), f32 accumulation on the MXU
            s = lax.dot_general(q, k, (((1,), (1,)), ((), ())),
                                preferred_element_type=jnp.float32) * scale
            s = jnp.where(causal, s, MASK_VALUE)

            m = jnp.max(s, axis=-1, keepdims=True)
            p = jnp.exp(s - m)
            denom = jnp.sum(p, axis=-1, keepdims=True)      # (T, 1)

            y = jnp.dot(p.astype(v.dtype), v,
                        preferred_element_type=jnp.float32)  # (T, hd)
            # deferred softmax normalization on the EUP (free slot)
            y = y * pl.reciprocal(denom, approx=True)
            parts.append(y)

        out = parts[0] if len(parts) == 1 else jnp.concatenate(parts, axis=-1)
        o_ref[0] = out.astype(o_ref.dtype)          # single full-lane store
    return kernel


def causal_attention(qkv, n_head):
    B, T, C3 = qkv.shape
    C = C3 // 3
    hd = C // n_head

    if hd % 128 == 0:
        heads_per_step = 1
    elif 128 % hd == 0:
        heads_per_step = min(128 // hd, n_head)
    else:
        heads_per_step = n_head     # TODO(synk): head_dim not 128-compatible
    assert n_head % heads_per_step == 0
    lane_blk = heads_per_step * hd
    n_groups = n_head // heads_per_step
    assert lane_blk % 128 == 0 or lane_blk == C3, \
        "attention lane block must be 128-aligned"

    q_spec = pl.BlockSpec((1, T, lane_blk), lambda b, g: (b, 0, g))
    k_spec = pl.BlockSpec((1, T, lane_blk), lambda b, g: (b, 0, n_groups + g))
    v_spec = pl.BlockSpec((1, T, lane_blk), lambda b, g: (b, 0, 2 * n_groups + g))

    return pl.pallas_call(
        _make_attn_kernel(heads_per_step, hd),
        out_shape=jax.ShapeDtypeStruct((B, T, C), qkv.dtype),
        grid=(B, n_groups),
        in_specs=[q_spec, k_spec, v_spec],
        out_specs=pl.BlockSpec((1, T, lane_blk), lambda b, g: (b, 0, g)),
        compiler_params=pltpu.CompilerParams(
            dimension_semantics=("parallel", "parallel"),
            vmem_limit_bytes=VMEM_LIMIT),
    )(qkv, qkv, qkv)


# ---------------------------------------------------------------------------
# Kernel 4: fused final LayerNorm + mean over the sequence: (B,T,C) -> (B,C)
# ---------------------------------------------------------------------------
def _lnf_mean_kernel(x_ref, g_ref, o_ref):
    x = x_ref[0].astype(jnp.float32)                    # (T, C)
    y = _layernorm_f32(x, g_ref[...].astype(jnp.float32))
    o_ref[0] = jnp.mean(y, axis=0, keepdims=True).astype(o_ref.dtype)


def final_ln_mean(x, gain):
    B, T, C = x.shape
    out = pl.pallas_call(
        _lnf_mean_kernel,
        out_shape=jax.ShapeDtypeStruct((B, 1, C), jnp.float32),
        grid=(B,),
        in_specs=[pl.BlockSpec((1, T, C), lambda b: (b, 0, 0)),
                  pl.BlockSpec((1, C), lambda b: (0, 0))],
        out_specs=pl.BlockSpec((1, 1, C), lambda b: (b, 0, 0)),
        compiler_params=pltpu.CompilerParams(
            dimension_semantics=("parallel",),
            vmem_limit_bytes=VMEM_LIMIT),
    )(x, gain)
    return out[:, 0, :]


# ---------------------------------------------------------------------------
# GPT2Enc forward
# ---------------------------------------------------------------------------
def gpt2_enc_forward(idx, params, n_head):
    B, T = idx.shape
    C = params["wte"].shape[1]

    # embeddings (+ emb dropout = identity in eval)
    # TODO(synk): embedding gather left to XLA (jnp.take); a Pallas version
    # needs a scalar-prefetch row-gather BlockSpec.
    tok = jnp.take(params["wte"], idx, axis=0)                 # (B, T, C) bf16
    pos = params["wpe"][:T]                                    # (T, C)   bf16
    x2d = (tok.astype(jnp.float32) +
           pos[None, :, :].astype(jnp.float32)).astype(DTYPE).reshape(B * T, C)

    for bp in params["blocks"]:
        # --- attention sub-block: LN fused into the qkv projection ---
        qkv = ln_linear(x2d, bp["ln1_w"], bp["w_attn"])        # (B*T, 3C)
        y = causal_attention(qkv.reshape(B, T, 3 * C), n_head) # (B, T, C)
        # c_proj with fused residual add (resid dropout = identity in eval)
        x2d = linear(y.reshape(B * T, C), bp["w_attn_proj"], residual=x2d)

        # --- MLP sub-block: LN + GELU fused into c_fc ---
        h = ln_linear(x2d, bp["ln2_w"], bp["w_fc"], activation="gelu")
        x2d = linear(h, bp["w_fc_proj"], residual=x2d)

    return final_ln_mean(x2d.reshape(B, T, C), params["lnf_w"])   # (B, C) f32


# ---------------------------------------------------------------------------
# Parameter init (mirrors GPT2Enc._init_weights; matmul weights stored
# transposed, (in, out), so kernels compute x @ W^T of the torch layout).
# ---------------------------------------------------------------------------
def init_params(key, vocab_size, block_size, n_layer, n_head, n_embd):
    C = n_embd
    keys = iter(jax.random.split(key, 2 + 4 * n_layer))
    std = 0.02
    proj_std = 0.02 / math.sqrt(2 * n_layer)

    def normal(k, shape, s):
        return (s * jax.random.normal(k, shape, jnp.float32)).astype(DTYPE)

    params = {
        "wte": normal(next(keys), (vocab_size, C), std),
        "wpe": normal(next(keys), (block_size, C), std),
        "blocks": [],
        "lnf_w": jnp.ones((1, C), jnp.float32),
    }
    for _ in range(n_layer):
        params["blocks"].append({
            "ln1_w": jnp.ones((1, C), jnp.float32),
            "w_attn": normal(next(keys), (C, 3 * C), std),
            "w_attn_proj": normal(next(keys), (C, C), proj_std),
            "ln2_w": jnp.ones((1, C), jnp.float32),
            "w_fc": normal(next(keys), (C, 4 * C), std),
            "w_fc_proj": normal(next(keys), (4 * C, C), proj_std),
        })
    return params


# ---------------------------------------------------------------------------
# Pure-JAX f32 reference (uses the same bf16 parameter values, upcast to f32)
# ---------------------------------------------------------------------------
def _reference_forward(idx, params, n_head):
    B, T = idx.shape
    C = params["wte"].shape[1]
    hd = C // n_head

    def f32(a):
        return a.astype(jnp.float32)

    def ln(v, w):
        mu = v.mean(-1, keepdims=True)
        var = ((v - mu) ** 2).mean(-1, keepdims=True)
        return (v - mu) / jnp.sqrt(var + LN_EPS) * f32(w)[0]

    x = f32(jnp.take(params["wte"], idx, axis=0)) + f32(params["wpe"][:T])[None]
    for bp in params["blocks"]:
        h = ln(x, bp["ln1_w"])
        qkv = h @ f32(bp["w_attn"])
        q, k, v = jnp.split(qkv, 3, axis=-1)
        q = q.reshape(B, T, n_head, hd).transpose(0, 2, 1, 3)
        k = k.reshape(B, T, n_head, hd).transpose(0, 2, 1, 3)
        v = v.reshape(B, T, n_head, hd).transpose(0, 2, 1, 3)
        s = jnp.einsum("bhqd,bhkd->bhqk", q, k) / math.sqrt(hd)
        mask = jnp.tril(jnp.ones((T, T), bool))
        s = jnp.where(mask[None, None], s, -jnp.inf)
        att = jax.nn.softmax(s, axis=-1)
        y = jnp.einsum("bhqk,bhkd->bhqd", att, v)
        y = y.transpose(0, 2, 1, 3).reshape(B, T, C)
        x = x + y @ f32(bp["w_attn_proj"])
        h = ln(x, bp["ln2_w"])
        h = jax.nn.gelu(h @ f32(bp["w_fc"]), approximate=False)
        x = x + h @ f32(bp["w_fc_proj"])
    x = ln(x, params["lnf_w"])
    return x.mean(1)


if __name__ == "__main__":
    # small hyper-params consistent with the module; n_embd multiple of 128
    # keeps all lane blocks aligned, head_dim = 128 -> one head per lane group.
    block_size = 8
    vocab_size = 64
    n_layer = 2
    n_head = 2
    n_embd = 256
    B, T = 2, block_size

    key = jax.random.PRNGKey(0)
    k_params, k_idx = jax.random.split(key)
    params = init_params(k_params, vocab_size, block_size, n_layer, n_head, n_embd)
    idx = jax.random.randint(k_idx, (B, T), 0, vocab_size, dtype=jnp.int32)

    out = gpt2_enc_forward(idx, params, n_head)
    out = jax.block_until_ready(out)

    ref = _reference_forward(idx, params, n_head)
    assert out.shape == (B, n_embd), out.shape
    err = float(jnp.max(jnp.abs(out - ref)))
    # bf16 activations vs f32 reference -> relaxed tolerance
    assert jnp.allclose(out, ref, atol=3e-2, rtol=3e-2), \
        f"mismatch vs reference: max abs err {err}"

    print("KERNEL_OK")
</pallas_src>

<mosaic_0001>
module attributes {stable_mosaic.version = 11 : i64} {
  func.func @kernel(%arg0: i32, %arg1: i32, %arg2: memref<16x256xbf16, #tpu.memory_space<vmem>>, %arg3: memref<1x256xf32, #tpu.memory_space<vmem>>, %arg4: memref<256x768xbf16, #tpu.memory_space<vmem>>, %arg5: memref<16x768xbf16, #tpu.memory_space<vmem>>) attributes {dimension_semantics = [#tpu.dimension_semantics<parallel>, #tpu.dimension_semantics<parallel>], iteration_bounds = array<i64: 1, 1>, scalar_prefetch = 0 : i64, scratch_operands = 0 : i64, tpu.core_type = #tpu.core_type<tc>, window_params = [{transform_indices = @transform_0, window_bounds = array<i64: 16, 256>}, {pipeline_mode = #tpu.pipeline_mode<synchronous>, transform_indices = @transform_1, window_bounds = array<i64: 1, 256>}, {transform_indices = @transform_2, window_bounds = array<i64: 256, 768>}, {transform_indices = @transform_3, window_bounds = array<i64: 16, 768>}]} {
    %c0 = arith.constant 0 : index
    %c0_0 = arith.constant 0 : index
    %0 = vector.load %arg2[%c0, %c0_0] : memref<16x256xbf16, #tpu.memory_space<vmem>>, vector<16x256xbf16>
    %1 = arith.extf %0 : vector<16x256xbf16> to vector<16x256xf32>
    %c0_1 = arith.constant 0 : index
    %c0_2 = arith.constant 0 : index
    %2 = vector.load %arg3[%c0_1, %c0_2] : memref<1x256xf32, #tpu.memory_space<vmem>>, vector<1x256xf32>
    %cst = arith.constant dense<0.000000e+00> : vector<16xf32>
    %3 = vector.multi_reduction <add>, %1, %cst [1] : vector<16x256xf32> to vector<16xf32>
    %4 = vector.shape_cast %3 : vector<16xf32> to vector<16x1xf32>
    %cst_3 = arith.constant 2.560000e+02 : f32
    %5 = vector.broadcast %cst_3 : f32 to vector<16x1xf32>
    %6 = arith.divf %4, %5 : vector<16x1xf32>
    %7 = vector.broadcast %6 : vector<16x1xf32> to vector<16x256xf32>
    %8 = arith.subf %1, %7 : vector<16x256xf32>
    %9 = arith.mulf %8, %8 : vector<16x256xf32>
    %cst_4 = arith.constant dense<0.000000e+00> : vector<16xf32>
    %10 = vector.multi_reduction <add>, %9, %cst_4 [1] : vector<16x256xf32> to vector<16xf32>
    %11 = vector.shape_cast %10 : vector<16xf32> to vector<16x1xf32>
    %cst_5 = arith.constant 2.560000e+02 : f32
    %12 = vector.broadcast %cst_5 : f32 to vector<16x1xf32>
    %13 = arith.divf %11, %12 : vector<16x1xf32>
    %cst_6 = arith.constant 9.99999974E-6 : f32
    %14 = vector.broadcast %cst_6 : f32 to vector<16x1xf32>
    %15 = arith.addf %13, %14 : vector<16x1xf32>
    %16 = math.rsqrt %15 : vector<16x1xf32>
    %17 = vector.broadcast %16 : vector<16x1xf32> to vector<16x256xf32>
    %18 = arith.mulf %8, %17 : vector<16x256xf32>
    %19 = vector.broadcast %2 : vector<1x256xf32> to vector<16x256xf32>
    %20 = arith.mulf %18, %19 : vector<16x256xf32>
    %21 = arith.truncf %20 : vector<16x256xf32> to vector<16x256xbf16>
    %c0_7 = arith.constant 0 : index
    %c0_8 = arith.constant 0 : index
    %22 = vector.load %arg4[%c0_7, %c0_8] : memref<256x768xbf16, #tpu.memory_space<vmem>>, vector<256x768xbf16>
    %cst_9 = arith.constant dense<0.000000e+00> : vector<16x768xf32>
    %23 = tpu.matmul %21, %22, %cst_9 {dimension_numbers = #tpu.dot_dimension_numbers<[1], [0], [0], [1], [0, 0, 1, 1], [], []>} : vector<16x256xbf16>, vector<256x768xbf16>, vector<16x768xf32> -> vector<16x768xf32>
    %24 = arith.truncf %23 : vector<16x768xf32> to vector<16x768xbf16>
    %c0_10 = arith.constant 0 : index
    %c0_11 = arith.constant 0 : index
    %25 = vector.load %arg5[%c0_10, %c0_11] : memref<16x768xbf16, #tpu.memory_space<vmem>>, vector<16x768xbf16>
    tpu.vector_store %arg5[%c0_10, %c0_11], %24 {strides = array<i32>} : memref<16x768xbf16, #tpu.memory_space<vmem>>, vector<16x768xbf16>,
    return
  }
  func.func @transform_0(%arg0: i32, %arg1: i32) -> (i32, i32) {
    %c0_i32 = arith.constant 0 : i32
    %c0_i32_0 = arith.constant 0 : i32
    return %arg0, %c0_i32 : i32, i32
  }
  func.func @transform_1(%arg0: i32, %arg1: i32) -> (i32, i32) {
    %c0_i32 = arith.constant 0 : i32
    %c0_i32_0 = arith.constant 0 : i32
    %c0_i32_1 = arith.constant 0 : i32
    return %c0_i32, %c0_i32_0 : i32, i32
  }
  func.func @transform_2(%arg0: i32, %arg1: i32) -> (i32, i32) {
    %c0_i32 = arith.constant 0 : i32
    %c0_i32_0 = arith.constant 0 : i32
    return %c0_i32, %arg1 : i32, i32
  }
  func.func @transform_3(%arg0: i32, %arg1: i32) -> (i32, i32) {
    %c0_i32 = arith.constant 0 : i32
    return %arg0, %arg1 : i32, i32
  }
}

</mosaic_0001>

<bundles_post_ra>
// kernel: tpu_custom_call.1
= control target key start
LH: loop header
LB: loop body
LE: loop exit
PB: predicated region body
PF: predicated region fallthrough
CT: control target
= control target key end

     0   :  { %8 = vsyncpa [#allocation3], 0  ;;  %s1321_s0 = inlined_call_operand.hbm [shape: bf16[16,256], index: 0, kind: input, shape index: {}]   ;;  %s1322_s1 = inlined_call_operand.vmem [shape: f32[1,256], index: 1, kind: input, shape index: {}]   ;;  %s1323_s2 = inlined_call_operand.hbm [shape: bf16[256,768], index: 2, kind: input, shape index: {}]   ;;  %s1324_s3 = inlined_call_operand.hbm [shape: bf16[16,768], index: 3, kind: output, shape index: {}]  }
   0x1   :  { %9 = vsyncpa [#allocation6], 0 }
   0x2   :  { %10 = vsyncpa [#allocation4], 0  ;;  %s1200_s12 = smov [#allocation2]   ;;  %s1128_s16 = scalar_lea.hbm %s1321_s0, 256 }
   0x3   :  { %s16_s13 = sshll.u32 %s1200_s12, 4  ;;  %p1129_p0 = scmp.ne.s32.totalorder %s1321_s0, %s1128_s16  ;;  %s17_s13 = int_to_ptr.vmem [resolvable:$true] %s16_s13 }
   0x4   :  { %p1132_p1 = scmp.lt.u32.totalorder %s1128_s16, %s1321_s0 }
   0x6   :  { %p1134_p2 = pnand %p1132_p1, %p1129_p0 }
   0x8   :  { %1137 = shalt.err (!%p1134_p2)
}
   0x9   :  { %s1138_s21 = scalar_lea.vmem %s17_s13, 256  ;;  %p1143_p4 = scmp.lt.s32.totalorder %s17_s13, %s17_s13 }
   0xa   :  { %p1139_p3 = scmp.ne.s32.totalorder %s17_s13, %s1138_s21  ;;  %p1144_p5 = scmp.lt.s32.totalorder %s1138_s21, %s1138_s21 }
   0xc   :  { %p1145_p6 = por %p1144_p5, %p1143_p4 }
   0xe   :  { %p1146_p7 = pnand %p1145_p6, %p1139_p3 }
  0x10   :  { %1149 = shalt.err (!%p1146_p7)
}
  0x11   :  { %s1201_s22 = smov 128   ;;  %s1202_s23 = smov 8  }
  0x12   :  { %22 = dma.hbm_to_vmem [thread:$0]  %s1321_s0, 256, %s17_s13, [#allocation3], %s1201_s22, %s1201_s22, %s1202_s23  }
  0x13   :  { %s1203_s26 = smov [#allocation5]   ;;  %s1150_s30 = scalar_lea.hbm %s1323_s2, 12288 }
  0x14   :  { %s30_s27 = sshll.u32 %s1203_s26, 4  ;;  %p1151_p8 = scmp.ne.s32.totalorder %s1323_s2, %s1150_s30  ;;  %s31_s27 = int_to_ptr.vmem [resolvable:$true] %s30_s27 }
  0x15   :  { %p1154_p9 = scmp.lt.u32.totalorder %s1150_s30, %s1323_s2 }
  0x17   :  { %p1156_p10 = pnand %p1154_p9, %p1151_p8 }
  0x19   :  { %1159 = shalt.err (!%p1156_p10)
}
  0x1a   :  { %s1160_s8 = scalar_lea.vmem %s31_s27, 12288  ;;  %p1165_p12 = scmp.lt.s32.totalorder %s31_s27, %s31_s27 }
  0x1b   :  { %p1161_p11 = scmp.ne.s32.totalorder %s31_s27, %s1160_s8  ;;  %p1166_p13 = scmp.lt.s32.totalorder %s1160_s8, %s1160_s8 }
  0x1d   :  { %p1167_p0 = por %p1166_p13, %p1165_p12 }
  0x1f   :  { %p1168_p1 = pnand %p1167_p0, %p1161_p11 }
  0x21   :  { %1171 = shalt.err (!%p1168_p1)
}
  0x22   :  { %s1204_s0 = smov 384   ;;  %s1205_s9 = smov 24  }
  0x23   :  { %36 = dma.hbm_to_vmem [thread:$0]  %s1323_s2, 12288, %s31_s27, [#allocation6], %s1204_s0, %s1204_s0, %s1205_s9  }
  0x24   :  { %1194 = dma.done.wait [#allocation3], 256  }
  0x25   :  { %1195 = vsyncadd [#allocation3], 4294967040 }
  0x26   :  { %1196 = dma.done.wait [#allocation6], 12288  }
  0x27   :  { %1197 = vsyncadd [#allocation6], 4294955008  ;;  %v1254_v0 = vld [vmem:[#allocation2] sm:$0xff]  ;;  %v1256_v1 = vld [vmem:[#allocation2 + $0x8] sm:$0xff] }
  0x28   :  { %v45_v2 = vunpack.c.l.bf16 %v1254_v0  ;;  %v46_v3 = vunpack.c.h.bf16 %v1254_v0  ;;  %v47_v4 = vunpack.c.l.bf16 %v1256_v1  ;;  %v48_v5 = vunpack.c.h.bf16 %v1256_v1  ;;  %v980_v8 = vld [vmem:[#allocation5 + $0x4] ss:$24 sps:$4 sm:$0xff]   ;;  %v982_v9 = vld [vmem:[#allocation5] ss:$24 sps:$4 sm:$0xff]   ;;  %v986_v12 = vld [vmem:[#allocation5 + $0x34] ss:$24 sps:$4 sm:$0xff]  }
  0x29   :  { %v983_v10 = vld [vmem:[#allocation5 + $0xc] ss:$24 sps:$4 sm:$0xff]   ;;  %v985_v11 = vld [vmem:[#allocation5 + $0x8] ss:$24 sps:$4 sm:$0xff]   ;;  %676 = vmatprep.subr.bf16.mxu0 %v980_v8  ;;  %v989_v13 = vld [vmem:[#allocation5 + $0x3c] ss:$24 sps:$4 sm:$0xff]  }
  0x2a   :  { %v50_v6 = vadd.f32 %v46_v3, %v45_v2  ;;  %v53_v7 = vadd.f32 %v48_v5, %v47_v4  ;;  %719 = vmatprep.subr.bf16.mxu1 %v983_v10  ;;  %677 = vmatpush1.bf16.msra.mxu0 %v982_v9  ;;  %v988_v14 = vld [vmem:[#allocation5 + $0x30] ss:$24 sps:$4 sm:$0xff]   ;;  %v992_v16 = vld [vmem:[#allocation5 + $0x64] ss:$24 sps:$4 sm:$0xff]   ;;  %v994_v18 = vld [vmem:[#allocation5 + $0x60] ss:$24 sps:$4 sm:$0xff]  }
  0x2b   :  { %720 = vmatpush1.bf16.msra.mxu1 %v985_v11  ;;  %v991_v15 = vld [vmem:[#allocation5 + $0x38] ss:$24 sps:$4 sm:$0xff]   ;;  %678 = vmatprep.subr.bf16.mxu0 %v986_v12  ;;  %v995_v17 = vld [vmem:[#allocation5 + $0x6c] ss:$24 sps:$4 sm:$0xff]   ;;  %v997_v19 = vld [vmem:[#allocation5 + $0x68] ss:$24 sps:$4 sm:$0xff]  }
  0x2c   :  { %51 = vadd.xlane.f32.xlu0 %v50_v6  ;;  %721 = vmatprep.subr.bf16.mxu1 %v989_v13  ;;  %v998_v20 = vld [vmem:[#allocation5 + $0x94] ss:$24 sps:$4 sm:$0xff]   ;;  %v1000_v22 = vld [vmem:[#allocation5 + $0x90] ss:$24 sps:$4 sm:$0xff]   ;;  %v1004_v24 = vld [vmem:[#allocation5 + $0xc4] ss:$24 sps:$4 sm:$0xff]  }
  0x2d   :  { %v1001_v21 = vld [vmem:[#allocation5 + $0x9c] ss:$24 sps:$4 sm:$0xff]   ;;  %v1003_v23 = vld [vmem:[#allocation5 + $0x98] ss:$24 sps:$4 sm:$0xff]   ;;  %v1007_v25 = vld [vmem:[#allocation5 + $0xcc] ss:$24 sps:$4 sm:$0xff]  }
  0x2e   :  { %679 = vmatpush1.bf16.msra.mxu0 %v988_v14  ;;  %v1006_v26 = vld [vmem:[#allocation5 + $0xc0] ss:$24 sps:$4 sm:$0xff]   ;;  %v1010_v28 = vld [vmem:[#allocation5 + $0xf4] ss:$24 sps:$4 sm:$0xff]   ;;  %v1012_v30 = vld [vmem:[#allocation5 + $0xf0] ss:$24 sps:$4 sm:$0xff]  }
  0x2f   :  { %722 = vmatpush1.bf16.msra.mxu1 %v991_v15  ;;  %680 = vmatprep.subr.bf16.mxu0 %v992_v16  ;;  %v1009_v27 = vld [vmem:[#allocation5 + $0xc8] ss:$24 sps:$4 sm:$0xff]   ;;  %v1013_v29 = vld [vmem:[#allocation5 + $0xfc] ss:$24 sps:$4 sm:$0xff]   ;;  %v1015_v31 = vld [vmem:[#allocation5 + $0xf8] ss:$24 sps:$4 sm:$0xff]  }
  0x30   :  { %54 = vadd.xlane.f32.xlu0 %v53_v7  ;;  %723 = vmatprep.subr.bf16.mxu1 %v995_v17  ;;  %v1016_v32 = vld [vmem:[#allocation5 + $0x124] ss:$24 sps:$4 sm:$0xff]   ;;  %v1018_v34 = vld [vmem:[#allocation5 + $0x120] ss:$24 sps:$4 sm:$0xff]   ;;  %v1022_v36 = vld [vmem:[#allocation5 + $0x154] ss:$24 sps:$4 sm:$0xff]  }
  0x31   :  { %v1019_v33 = vld [vmem:[#allocation5 + $0x12c] ss:$24 sps:$4 sm:$0xff]   ;;  %v1021_v35 = vld [vmem:[#allocation5 + $0x128] ss:$24 sps:$4 sm:$0xff]   ;;  %v1025_v37 = vld [vmem:[#allocation5 + $0x15c] ss:$24 sps:$4 sm:$0xff]  }
  0x32   :  { %681 = vmatpush1.bf16.msra.mxu0 %v994_v18  ;;  %v1024_v38 = vld [vmem:[#allocation5 + $0x150] ss:$24 sps:$4 sm:$0xff]   ;;  %v1028_v40 = vld [vmem:[#allocation5 + $0x184] ss:$24 sps:$4 sm:$0xff]   ;;  %v1030_v42 = vld [vmem:[#allocation5 + $0x180] ss:$24 sps:$4 sm:$0xff]  }
  0x33   :  { %724 = vmatpush1.bf16.msra.mxu1 %v997_v19  ;;  %682 = vmatprep.subr.bf16.mxu0 %v998_v20  ;;  %v1027_v39 = vld [vmem:[#allocation5 + $0x158] ss:$24 sps:$4 sm:$0xff]   ;;  %v1031_v41 = vld [vmem:[#allocation5 + $0x18c] ss:$24 sps:$4 sm:$0xff]   ;;  %v1033_v43 = vld [vmem:[#allocation5 + $0x188] ss:$24 sps:$4 sm:$0xff]  }
  0x34   :  { %725 = vmatprep.subr.bf16.mxu1 %v1001_v21  ;;  %v1034_v44 = vld [vmem:[#allocation5 + $0x1b4] ss:$24 sps:$4 sm:$0xff]   ;;  %v1036_v46 = vld [vmem:[#allocation5 + $0x1b0] ss:$24 sps:$4 sm:$0xff]   ;;  %v1040_v62 = vld [vmem:[#allocation5 + $0x1e4] ss:$24 sps:$4 sm:$0xff]  }
  0x35   :  { %v1037_v45 = vld [vmem:[#allocation5 + $0x1bc] ss:$24 sps:$4 sm:$0xff]   ;;  %v1039_v47 = vld [vmem:[#allocation5 + $0x1b8] ss:$24 sps:$4 sm:$0xff]   ;;  %v1043_v0 = vld [vmem:[#allocation5 + $0x1ec] ss:$24 sps:$4 sm:$0xff]  }
  0x36   :  { %683 = vmatpush1.bf16.msra.mxu0 %v1000_v22  ;;  %v1042_v63 = vld [vmem:[#allocation5 + $0x1e0] ss:$24 sps:$4 sm:$0xff]   ;;  %v1046_v1 = vld [vmem:[#allocation5 + $0x214] ss:$24 sps:$4 sm:$0xff]   ;;  %v1052_v6 = vld [vmem:[#allocation5 + $0x244] ss:$24 sps:$4 sm:$0xff]  }
  0x37   :  { %726 = vmatpush1.bf16.msra.mxu1 %v1003_v23  ;;  %684 = vmatprep.subr.bf16.mxu0 %v1004_v24  ;;  %v1054_v7 = vld [vmem:[#allocation5 + $0x240] ss:$24 sps:$4 sm:$0xff]   ;;  %v1055_v8 = vld [vmem:[#allocation5 + $0x24c] ss:$24 sps:$4 sm:$0xff]   ;;  %v1061_v11 = vld [vmem:[#allocation5 + $0x27c] ss:$24 sps:$4 sm:$0xff]  }
  0x38   :  { %727 = vmatprep.subr.bf16.mxu1 %v1007_v25  ;;  %v1057_v9 = vld [vmem:[#allocation5 + $0x248] ss:$24 sps:$4 sm:$0xff]   ;;  %v1058_v10 = vld [vmem:[#allocation5 + $0x274] ss:$24 sps:$4 sm:$0xff]   ;;  %v1063_v13 = vld [vmem:[#allocation5 + $0x278] ss:$24 sps:$4 sm:$0xff]  }
  0x39   :  { %v1060_v12 = vld [vmem:[#allocation5 + $0x270] ss:$24 sps:$4 sm:$0xff]   ;;  %v1064_v14 = vld [vmem:[#allocation5 + $0x2a4] ss:$24 sps:$4 sm:$0xff]   ;;  %v1066_v16 = vld [vmem:[#allocation5 + $0x2a0] ss:$24 sps:$4 sm:$0xff]  }
  0x3a   :  { %685 = vmatpush1.bf16.msra.mxu0 %v1006_v26  ;;  %v1067_v15 = vld [vmem:[#allocation5 + $0x2ac] ss:$24 sps:$4 sm:$0xff]   ;;  %v1069_v17 = vld [vmem:[#allocation5 + $0x2a8] ss:$24 sps:$4 sm:$0xff]   ;;  %v1073_v19 = vld [vmem:[#allocation5 + $0x2dc] ss:$24 sps:$4 sm:$0xff]  }
  0x3b   :  { %728 = vmatpush1.bf16.msra.mxu1 %v1009_v27  ;;  %686 = vmatprep.subr.bf16.mxu0 %v1010_v28  ;;  %v1070_v18 = vld [vmem:[#allocation5 + $0x2d4] ss:$24 sps:$4 sm:$0xff]   ;;  %v1072_v20 = vld [vmem:[#allocation5 + $0x2d0] ss:$24 sps:$4 sm:$0xff]   ;;  %v84_v28 = vlaneseq }
  0x3c   :  { %729 = vmatprep.subr.bf16.mxu1 %v1013_v29  ;;  %v1075_v21 = vld [vmem:[#allocation5 + $0x2d8] ss:$24 sps:$4 sm:$0xff]   ;;  %v1078_v22 = vld [vmem:[#allocation5 + $0x14] ss:$24 sps:$4 sm:$0xff]  }
  0x3e   :  { %687 = vmatpush1.bf16.msra.mxu0 %v1012_v30  ;;  %v85_v30 = vshrl.u32 %v84_v28, 7 }
  0x3f   :  { %730 = vmatpush1.bf16.msra.mxu1 %v1015_v31  ;;  %688 = vmatprep.subr.bf16.mxu0 %v1016_v32 }
  0x40   :  { %731 = vmatprep.subr.bf16.mxu1 %v1019_v33  ;;  %v90_v31 = vsub.s32 1, %v85_v30  ;;  %v86_v32 = vsub.s32 0, %v85_v30 }
  0x42   :  { %689 = vmatpush1.bf16.msra.mxu0 %v1018_v34  ;;  %v49_v34 = vld [vmem:[%s1322_s1] sm:$0x3]  ;;  %s1206_s1 = smov [#allocation7]  }
  0x43   :  { %732 = vmatpush1.bf16.msra.mxu1 %v1021_v35  ;;  %690 = vmatprep.subr.bf16.mxu0 %v1022_v36  ;;  %v91_v36 = vrot.slane %v49_v34, %v90_v31  ;;  %s852_s13 = sshll.u32 %s1206_s1, 4  ;;  %s853_s13 = int_to_ptr.vmem [resolvable:$true] %s852_s13 }
  0x44   :  { %733 = vmatprep.subr.bf16.mxu1 %v1025_v37  ;;  %s1172_s14 = scalar_lea.vmem %s853_s13, 768  ;;  %p1177_p3 = scmp.lt.s32.totalorder %s853_s13, %s853_s13 }
  0x45   :  { %p1173_p2 = scmp.ne.s32.totalorder %s853_s13, %s1172_s14  ;;  %p1178_p4 = scmp.lt.s32.totalorder %s1172_s14, %s1172_s14 }
  0x46   :  { %691 = vmatpush1.bf16.msra.mxu0 %v1024_v38  ;;  %v87_v38 = vrot.slane %v49_v34, %v86_v32 }
  0x47   :  { %734 = vmatpush1.bf16.msra.mxu1 %v1027_v39  ;;  %692 = vmatprep.subr.bf16.mxu0 %v1028_v40  ;;  %p1179_p5 = por %p1178_p4, %p1177_p3 }
  0x48   :  { %735 = vmatprep.subr.bf16.mxu1 %v1031_v41 }
  0x49   :  { %p1180_p6 = pnand %p1179_p5, %p1173_p2 }
  0x4a   :  { %693 = vmatpush1.bf16.msra.mxu0 %v1030_v42 }
  0x4b   :  { %736 = vmatpush1.bf16.msra.mxu1 %v1033_v43  ;;  %694 = vmatprep.subr.bf16.mxu0 %v1034_v44 }
  0x4c   :  { %737 = vmatprep.subr.bf16.mxu1 %v1037_v45 }
  0x4e   :  { %695 = vmatpush1.bf16.msra.mxu0 %v1036_v46 }
  0x4f   :  { %738 = vmatpush1.bf16.msra.mxu1 %v1039_v47  ;;  %696 = vmatprep.subr.bf16.mxu0 %v1040_v62  ;;  %v1076_v47 = vld [vmem:[#allocation5 + $0x10] ss:$24 sps:$4 sm:$0xff]   ;;  %v1097_v62 = vld [vmem:[#allocation5 + $0x160] ss:$24 sps:$4 sm:$0xff]  }
  0x50   :  { %739 = vmatprep.subr.bf16.mxu1 %v1043_v0  ;;  %v1100_v0 = vld [vmem:[#allocation5 + $0x190] ss:$24 sps:$4 sm:$0xff]  }
  0x52   :  { %697 = vmatpush1.bf16.msra.mxu0 %v1042_v63  ;;  %v1102_v63 = vld [vmem:[#allocation5 + $0x194] ss:$24 sps:$4 sm:$0xff]  }
  0x53   :  { %698 = vmatprep.subr.bf16.mxu0 %v1046_v1  ;;  %v1103_v1 = vld [vmem:[#allocation5 + $0x1c0] ss:$24 sps:$4 sm:$0xff]  }
  0xb9   :  { %v52_v48 = vpop.xlane.xlu0 %51 }
  0xba   :  { %v57_v49 = vmul.f32 0.00390625, %v52_v48 }
  0xbc   :  { %v1272_v50 = vsub.f32 %v45_v2, %v57_v49  ;;  %v1276_v51 = vsub.f32 %v46_v3, %v57_v49  ;;  %v1045_v2 = vld [vmem:[#allocation5 + $0x1e8] ss:$24 sps:$4 sm:$0xff]   ;;  %v1081_v49 = vld [vmem:[#allocation5 + $0x44] ss:$24 sps:$4 sm:$0xff]  }
  0xbd   :  { %v55_v52 = vpop.xlane.xlu0 %54  ;;  %740 = vmatpush1.bf16.msra.mxu1 %v1045_v2  ;;  %v1048_v3 = vld [vmem:[#allocation5 + $0x210] ss:$24 sps:$4 sm:$0xff]   ;;  %v1105_v2 = vld [vmem:[#allocation5 + $0x1c4] ss:$24 sps:$4 sm:$0xff]  }
  0xbe   :  { %v58_v53 = vmul.f32 0.00390625, %v55_v52  ;;  %v63_v54 = vmul.f32 %v1272_v50, %v1272_v50  ;;  %v64_v55 = vmul.f32 %v1276_v51, %v1276_v51  ;;  %699 = vmatpush1.bf16.msra.mxu0 %v1048_v3  ;;  %v1082_v52 = vld [vmem:[#allocation5 + $0x70] ss:$24 sps:$4 sm:$0xff]   ;;  %v1108_v3 = vld [vmem:[#allocation5 + $0x1f4] ss:$24 sps:$4 sm:$0xff]  }
  0xbf   :  { %700 = vmatprep.subr.bf16.mxu0 %v1052_v6  ;;  %v1109_v6 = vld [vmem:[#allocation5 + $0x220] ss:$24 sps:$4 sm:$0xff]  }
  0xc0   :  { %v1284_v56 = vsub.f32 %v47_v4, %v58_v53  ;;  %v1288_v57 = vsub.f32 %v48_v5, %v58_v53  ;;  %v67_v58 = vadd.f32 %v64_v55, %v63_v54  ;;  %v1049_v4 = vld [vmem:[#allocation5 + $0x21c] ss:$24 sps:$4 sm:$0xff]   ;;  %v1051_v5 = vld [vmem:[#allocation5 + $0x218] ss:$24 sps:$4 sm:$0xff]  }
  0xc1   :  { %741 = vmatprep.subr.bf16.mxu1 %v1049_v4  ;;  %v1087_v53 = vld [vmem:[#allocation5 + $0xa4] ss:$24 sps:$4 sm:$0xff]   ;;  %v1085_v54 = vld [vmem:[#allocation5 + $0xa0] ss:$24 sps:$4 sm:$0xff]   ;;  %v1090_v55 = vld [vmem:[#allocation5 + $0xd4] ss:$24 sps:$4 sm:$0xff]  }
  0xc2   :  { %68 = vadd.xlane.f32.xlu1 %v67_v58  ;;  %v65_v59 = vmul.f32 %v1284_v56, %v1284_v56  ;;  %v66_v60 = vmul.f32 %v1288_v57, %v1288_v57  ;;  %742 = vmatpush1.bf16.msra.mxu1 %v1051_v5  ;;  %v1091_v58 = vld [vmem:[#allocation5 + $0x100] ss:$24 sps:$4 sm:$0xff]   ;;  %v1106_v4 = vld [vmem:[#allocation5 + $0x1f0] ss:$24 sps:$4 sm:$0xff]   ;;  %v1111_v5 = vld [vmem:[#allocation5 + $0x224] ss:$24 sps:$4 sm:$0xff]  }
  0xc3   :  { %701 = vmatpush1.bf16.msra.mxu0 %v1054_v7  ;;  %743 = vmatprep.subr.bf16.mxu1 %v1055_v8  ;;  %v1114_v7 = vld [vmem:[#allocation5 + $0x254] ss:$24 sps:$4 sm:$0xff]   ;;  %v1112_v8 = vld [vmem:[#allocation5 + $0x250] ss:$24 sps:$4 sm:$0xff]  }
  0xc4   :  { %v70_v61 = vadd.f32 %v66_v60, %v65_v59  ;;  %702 = vmatprep.subr.bf16.mxu0 %v1058_v10  ;;  %v1096_v59 = vld [vmem:[#allocation5 + $0x134] ss:$24 sps:$4 sm:$0xff]   ;;  %v1094_v60 = vld [vmem:[#allocation5 + $0x130] ss:$24 sps:$4 sm:$0xff]   ;;  %v1115_v10 = vld [vmem:[#allocation5 + $0x280] ss:$24 sps:$4 sm:$0xff]  }
  0xc6   :  { %71 = vadd.xlane.f32.xlu1 %v70_v61  ;;  %744 = vmatpush1.bf16.msra.mxu1 %v1057_v9  ;;  %v1099_v61 = vld [vmem:[#allocation5 + $0x164] ss:$24 sps:$4 sm:$0xff]  }
  0xc7   :  { %745 = vmatprep.subr.bf16.mxu1 %v1061_v11  ;;  %703 = vmatpush1.bf16.msra.mxu0 %v1060_v12  ;;  %v1117_v9 = vld [vmem:[#allocation5 + $0x284] ss:$24 sps:$4 sm:$0xff]   ;;  %v1120_v11 = vld [vmem:[#allocation5 + $0x2b4] ss:$24 sps:$4 sm:$0xff]   ;;  %v1118_v12 = vld [vmem:[#allocation5 + $0x2b0] ss:$24 sps:$4 sm:$0xff]  }
  0xc8   :  { %704 = vmatprep.subr.bf16.mxu0 %v1064_v14  ;;  %v1121_v14 = vld [vmem:[#allocation5 + $0x2e0] ss:$24 sps:$4 sm:$0xff]  }
  0xca   :  { %746 = vmatpush1.bf16.msra.mxu1 %v1063_v13  ;;  %v1123_v13 = vld [vmem:[#allocation5 + $0x2e4] ss:$24 sps:$4 sm:$0xff]  }
  0xcb   :  { %747 = vmatprep.subr.bf16.mxu1 %v1067_v15  ;;  %705 = vmatpush1.bf16.msra.mxu0 %v1066_v16 }
  0xcc   :  { %706 = vmatprep.subr.bf16.mxu0 %v1070_v18 }
  0xce   :  { %748 = vmatpush1.bf16.msra.mxu1 %v1069_v17 }
  0xcf   :  { %749 = vmatprep.subr.bf16.mxu1 %v1073_v19  ;;  %707 = vmatpush1.bf16.msra.mxu0 %v1072_v20 }
  0xd0   :  { %762 = vmatprep.subr.bf16.mxu0 %v1078_v22 }
  0xd2   :  { %750 = vmatpush1.bf16.msra.mxu1 %v1075_v21 }
 0x14f   :  { %v69_v23 = vpop.xlane.xlu1 %68 }
 0x150   :  { %v73_v24 = vmul.f32 0.00390625, %v69_v23 }
 0x152   :  { %v75_v25 = vadd.f32 1e-05, %v73_v24 }
 0x153   :  { %v72_v26 = vpop.xlane.xlu1 %71 }
 0x154   :  { %1124 = vrsqrt.f32 %v75_v25  ;;  %v74_v27 = vmul.f32 0.00390625, %v72_v26 }
 0x156   :  { %v76_v29 = vadd.f32 1e-05, %v74_v27 }
 0x158   :  { %1126 = vrsqrt.f32 %v76_v29 }
 0x15e   :  { %v1125_v33 = vpop.eup %1124 }
 0x15f   :  { %v80_v35 = vmul.f32 %v1125_v33, %v1276_v51  ;;  %v79_v37 = vmul.f32 %v1125_v33, %v1272_v50  ;;  %v1079_v50 = vld [vmem:[#allocation5 + $0x40] ss:$24 sps:$4 sm:$0xff]   ;;  %v1084_v51 = vld [vmem:[#allocation5 + $0x74] ss:$24 sps:$4 sm:$0xff]  }
 0x161   :  { %v95_v42 = vmul.f32 %v91_v36, %v80_v35  ;;  %v94_v44 = vmul.f32 %v87_v38, %v79_v37 }
 0x162   :  { %v1127_v39 = vpop.eup %1126 }
 0x163   :  { %v82_v40 = vmul.f32 %v1127_v39, %v1288_v57  ;;  %v81_v41 = vmul.f32 %v1127_v39, %v1284_v56  ;;  %v1088_v56 = vld [vmem:[#allocation5 + $0xd0] ss:$24 sps:$4 sm:$0xff]   ;;  %v1093_v57 = vld [vmem:[#allocation5 + $0x104] ss:$24 sps:$4 sm:$0xff]  }
 0x165   :  { %v97_v43 = vmul.f32 %v91_v36, %v82_v40  ;;  %v96_v45 = vmul.f32 %v87_v38, %v81_v41 }
 0x167   :  { %v99_v46 = vpack.c.bf16 %v97_v43, %v95_v42  ;;  %v1301_v48 = vpack.c.bf16 %v96_v45, %v94_v44 }
 0x169   :  { %708 = vmatprep.mubr.bf16.mxu0 %v99_v46  ;;  %751 = vmatprep.mubr.bf16.mxu1 %v99_v46 }
 0x16a   :  { %709 = vmatmul.mubr.bf16.vlgmr.msra.gmra.mrb[0].mxu0 %v1301_v48  ;;  %752 = vmatmul.mubr.bf16.vlgmr.msra.gmra.mrb[0].mxu1 %v1301_v48 }
 0x16b   :  { %763 = vmatpush1.bf16.msra.mxu0 %v1076_v47  ;;  %794 = vmatprep.mubr.bf16.mxu0 %v99_v46 }
 0x16c   :  { %764 = vmatprep.subr.bf16.mxu0 %v1081_v49 }
 0x16f   :  { %765 = vmatpush1.bf16.msra.mxu0 %v1079_v50 }
 0x170   :  { %766 = vmatprep.subr.bf16.mxu0 %v1084_v51 }
 0x173   :  { %767 = vmatpush1.bf16.msra.mxu0 %v1082_v52 }
 0x174   :  { %768 = vmatprep.subr.bf16.mxu0 %v1087_v53 }
 0x177   :  { %769 = vmatpush1.bf16.msra.mxu0 %v1085_v54 }
 0x178   :  { %770 = vmatprep.subr.bf16.mxu0 %v1090_v55 }
 0x17b   :  { %771 = vmatpush1.bf16.msra.mxu0 %v1088_v56 }
 0x17c   :  { %772 = vmatprep.subr.bf16.mxu0 %v1093_v57 }
 0x17f   :  { %773 = vmatpush1.bf16.msra.mxu0 %v1091_v58 }
 0x180   :  { %774 = vmatprep.subr.bf16.mxu0 %v1096_v59 }
 0x183   :  { %775 = vmatpush1.bf16.msra.mxu0 %v1094_v60 }
 0x184   :  { %776 = vmatprep.subr.bf16.mxu0 %v1099_v61 }
 0x187   :  { %777 = vmatpush1.bf16.msra.mxu0 %v1097_v62 }
 0x188   :  { %778 = vmatprep.subr.bf16.mxu0 %v1102_v63 }
 0x18b   :  { %779 = vmatpush1.bf16.msra.mxu0 %v1100_v0 }
 0x18c   :  { %780 = vmatprep.subr.bf16.mxu0 %v1105_v2 }
 0x18f   :  { %781 = vmatpush1.bf16.msra.mxu0 %v1103_v1 }
 0x190   :  { %782 = vmatprep.subr.bf16.mxu0 %v1108_v3 }
 0x193   :  { %783 = vmatpush1.bf16.msra.mxu0 %v1106_v4 }
 0x194   :  { %784 = vmatprep.subr.bf16.mxu0 %v1111_v5 }
 0x197   :  { %785 = vmatpush1.bf16.msra.mxu0 %v1109_v6 }
 0x198   :  { %786 = vmatprep.subr.bf16.mxu0 %v1114_v7 }
 0x19b   :  { %787 = vmatpush1.bf16.msra.mxu0 %v1112_v8 }
 0x19c   :  { %788 = vmatprep.subr.bf16.mxu0 %v1117_v9 }
 0x19f   :  { %789 = vmatpush1.bf16.msra.mxu0 %v1115_v10 }
 0x1a0   :  { %790 = vmatprep.subr.bf16.mxu0 %v1120_v11 }
 0x1a3   :  { %791 = vmatpush1.bf16.msra.mxu0 %v1118_v12 }
 0x1a4   :  { %792 = vmatprep.subr.bf16.mxu0 %v1123_v13 }
 0x1a7   :  { %793 = vmatpush1.bf16.msra.mxu0 %v1121_v14 }
 0x1aa   :  { %795 = vmatmul.mubr.bf16.vlgmr.msra.gmra.mrb[4].mxu0 %v1301_v48 }
 0x23d   :  { %v710_v15 = vpop.f32.mrb[0].mxu0  ;;  %v753_v16 = vpop.f32.mrb[0].mxu1 }
 0x23e   :  { %v712_v17 = vpop.f32.mrb[1].mxu0  ;;  %v755_v18 = vpop.f32.mrb[1].mxu1 }
 0x23f   :  { %v967_v19 = vpack.c.bf16 %v712_v17, %v710_v15  ;;  %v968_v20 = vpack.c.bf16 %v755_v18, %v753_v16  ;;  %v714_v21 = vpop.f32.mrb[2].mxu0  ;;  %v757_v22 = vpop.f32.mrb[2].mxu1 }
 0x240   :  { %v716_v23 = vpop.f32.mrb[3].mxu0  ;;  %v759_v24 = vpop.f32.mrb[3].mxu1 }
 0x241   :  { %841 = vst [vmem:[#allocation7] sm:$0xff] %v967_v19  ;;  %842 = vst [vmem:[#allocation7 + $0x8] sm:$0xff] %v968_v20  ;;  %v970_v25 = vpack.c.bf16 %v716_v23, %v714_v21  ;;  %v971_v26 = vpack.c.bf16 %v759_v24, %v757_v22 }
 0x243   :  { %844 = vst [vmem:[#allocation7 + $0x18] sm:$0xff] %v970_v25  ;;  %845 = vst [vmem:[#allocation7 + $0x20] sm:$0xff] %v971_v26 }
 0x27d   :  { %v796_v27 = vpop.f32.mrb[4].mxu0 }
 0x27e   :  { %v798_v28 = vpop.f32.mrb[5].mxu0 }
 0x27f   :  { %v969_v29 = vpack.c.bf16 %v798_v28, %v796_v27  ;;  %v800_v30 = vpop.f32.mrb[6].mxu0 }
 0x280   :  { %v802_v31 = vpop.f32.mrb[7].mxu0 }
 0x281   :  { %843 = vst [vmem:[#allocation7 + $0x10] sm:$0xff] %v969_v29  ;;  %v972_v32 = vpack.c.bf16 %v802_v31, %v800_v30 }
 0x283   :  { %846 = vst [vmem:[#allocation7 + $0x28] sm:$0xff] %v972_v32 }
 0x284   :  { %1183 = shalt.err (!%p1180_p6)
}
 0x285   :  { %s1184_s17 = scalar_lea.hbm %s1324_s3, 768 }
 0x286   :  { %p1185_p7 = scmp.ne.s32.totalorder %s1324_s3, %s1184_s17  ;;  %p1188_p8 = scmp.lt.u32.totalorder %s1184_s17, %s1324_s3 }
 0x288   :  { %p1190_p9 = pnand %p1188_p8, %p1185_p7 }
 0x28a   :  { %1193 = shalt.err (!%p1190_p9)
}
 0x28b   :  { %858 = dma.vmem_to_hbm [thread:$0]  %s853_s13, 768, %s1324_s3, [#allocation4], %s1204_s0, %s1204_s0, %s1205_s9  }
 0x28c   :  { %1198 = dma.done.wait [#allocation4], 768  }
 0x28d   :  { %1199 = vsyncadd [#allocation4], 4294966528 }
 0x28e   :  { %862 = vsyncpa [#allocation3], 1 }
 0x28f   :  { %863 = vsyncpa [#allocation6], 1 }
 0x290   :  { %864 = vsyncpa [#allocation4], 1 }

</bundles_post_ra>
